<compile_context>
chip_gen: v6e
topology: v6e:2x2x1
jax: 0.10.0
libtpu: 0.0.40
codegen_flags: <defaults>
</compile_context>

<pallas_src>
import functools

import jax
import jax.numpy as jnp
from jax.experimental import pallas as pl
from jax.experimental.pallas import tpu as pltpu

_BN_EPS = 1e-5
_LANE = 128


def _round_up(x, m):
    return ((x + m - 1) // m) * m


def _full_spec(shape):
    # Grid-less call: single block covering the whole array (block shape ==
    # full array dims satisfies the (8,128) rule).
    return pl.BlockSpec(shape, lambda: tuple(0 for _ in shape))


def _fused_mlp_kernel(*refs, n_hidden, f_out):
    """Fused (Linear -> BatchNorm1d(batch stats) -> ReLU) * n_hidden -> Linear.

    refs layout:
      refs[0]                     : x      (N, F0)              f32 (unpadded)
      refs[1 .. 1+n_layers-1]     : W_i^T  (F_i[p], F_{i+1}[p]) f32
                                    (hidden out-dims padded to 128; final
                                     layer's out-dim unpadded = f_out)
      refs[1+n_layers]            : vecs   (3*n_hidden + 1, Wmax) f32
                                    rows 3i / 3i+1 / 3i+2 = b_i / gamma_i / beta_i
                                    row 3*n_hidden          = final bias
      refs[-1]                    : out    (N, f_out)           f32 (unpadded)
    Padded weight columns / gamma / beta are zero, so padded lanes stay
    exactly 0 through BN + ReLU.
    """
    x_ref = refs[0]
    o_ref = refs[-1]
    n_layers = n_hidden + 1
    w_refs = refs[1:1 + n_layers]
    vecs_ref = refs[1 + n_layers]

    vecs = vecs_ref[...]                       # (3*n_hidden + 1, Wmax) f32
    h = x_ref[...]                             # (N, F0) f32
    n = h.shape[0]
    inv_n = 1.0 / n

    for i in range(n_hidden):
        fo = w_refs[i].shape[1]                # padded out-width of this layer
        b = vecs[3 * i:3 * i + 1, :fo]
        gamma = vecs[3 * i + 1:3 * i + 2, :fo]
        beta = vecs[3 * i + 2:3 * i + 3, :fo]

        # MXU: f32 matmul, f32 accumulation (tight parity; free at this size).
        y = jnp.dot(h, w_refs[i][...], preferred_element_type=jnp.float32) + b

        # BatchNorm1d, training-mode batch stats (biased var), two-pass.
        mean = jnp.sum(y, axis=0, keepdims=True) * inv_n
        d = y - mean
        var = jnp.sum(d * d, axis=0, keepdims=True) * inv_n

        # Folded affine + ReLU: 2 vector ops per element. Padded lanes:
        # gamma == 0 -> scale == 0, beta == mean == 0 -> shift == 0 -> h == 0.
        scale = jax.lax.rsqrt(var + _BN_EPS) * gamma
        shift = beta - mean * scale
        h = jnp.maximum(y * scale + shift, 0.0)

    # Final Linear (no BN / ReLU), written unpadded.
    b_fin = vecs[3 * n_hidden:3 * n_hidden + 1, :f_out]
    y = jnp.dot(h, w_refs[n_hidden][...], preferred_element_type=jnp.float32) + b_fin
    o_ref[...] = y.astype(o_ref.dtype)


def mlp_forward(x, packed_params, size_list):
    n = x.shape[0]
    f_out = size_list[-1]
    n_hidden = len(size_list) - 2

    in_specs = [_full_spec(x.shape)] + [_full_spec(t.shape) for t in packed_params]

    return pl.pallas_call(
        functools.partial(_fused_mlp_kernel, n_hidden=n_hidden, f_out=f_out),
        out_shape=jax.ShapeDtypeStruct((n, f_out), jnp.float32),
        in_specs=in_specs,
        out_specs=_full_spec((n, f_out)),
        compiler_params=pltpu.CompilerParams(
            vmem_limit_bytes=32 * 1024 * 1024),   # explicit; safe on v5e/v6e/v7x
    )(x, *packed_params)


@functools.partial(jax.jit, static_argnames=("size_list",))
def my_model_forward(x, packed_params, size_list):
    return mlp_forward(x, packed_params, size_list)


def init_params(key, size_list):
    """PyTorch-default init; returns (packed_params, raw_f32_params).

    packed: [W0^T (F0, F1p), W1^T (F1p, F2p), ..., WL^T (F{L-1}p, f_out),
             vecs (3*n_hidden + 1, Wmax)]  -- all f32, padded entries zero.
            Only out-feature dims of hidden layers are padded to 128; the
            layer-0 contraction dim and the final output dim stay natural.
    raw:    unpadded f32 params for the pure-JAX reference.
    """
    n_layers = len(size_list) - 1
    n_hidden = n_layers - 1
    f_out = size_list[-1]

    # Padded widths: hidden layer outputs -> multiple of 128; final -> natural.
    out_pad = [_round_up(size_list[i + 1], _LANE) for i in range(n_hidden)] + [f_out]
    in_pad = [size_list[0]] + out_pad[:-1]
    wmax = max(out_pad)

    weights, raw = [], []
    vecs = jnp.zeros((3 * n_hidden + 1, wmax), jnp.float32)

    for i in range(n_layers):
        fan_in, fan_out = size_list[i], size_list[i + 1]
        key, kw, kb = jax.random.split(key, 3)
        bound = 1.0 / (fan_in ** 0.5)
        w = jax.random.uniform(kw, (fan_out, fan_in), jnp.float32, -bound, bound)
        b = jax.random.uniform(kb, (fan_out,), jnp.float32, -bound, bound)

        w_t_p = (jnp.zeros((in_pad[i], out_pad[i]), jnp.float32)
                 .at[:fan_in, :fan_out].set(w.T))
        weights.append(w_t_p)

        layer = {"w": w, "b": b}
        if i < n_hidden:
            vecs = vecs.at[3 * i, :fan_out].set(b)            # bias
            vecs = vecs.at[3 * i + 1, :fan_out].set(1.0)      # gamma
            # beta row stays 0
            layer["gamma"] = jnp.ones((fan_out,), jnp.float32)
            layer["beta"] = jnp.zeros((fan_out,), jnp.float32)
        else:
            vecs = vecs.at[3 * n_hidden, :fan_out].set(b)     # final bias
        raw.append(layer)

    packed = weights + [vecs]
    return packed, raw


def _ref_forward(x, raw_params):
    # Pure-JAX f32 reference mirroring the PyTorch module (training-mode BN).
    # TODO(synk): running_mean/running_var buffers are not tracked (eval-mode
    # BN would use them); forward here matches train-mode batch statistics.
    h = x
    n_layers = len(raw_params)
    for i, lp in enumerate(raw_params):
        y = h @ lp["w"].T + lp["b"]
        if i < n_layers - 1:
            mean = jnp.mean(y, axis=0, keepdims=True)
            var = jnp.mean((y - mean) ** 2, axis=0, keepdims=True)
            y = (y - mean) * jax.lax.rsqrt(var + _BN_EPS) * lp["gamma"] + lp["beta"]
            y = jnp.maximum(y, 0.0)
        h = y
    return h


if __name__ == "__main__":
    size_list = (32, 64, 48, 16)   # 2x (Linear+BN+ReLU) blocks + final Linear
    batch = 8

    key = jax.random.PRNGKey(0)
    key, kx, kp = jax.random.split(key, 3)
    x = jax.random.normal(kx, (batch, size_list[0]), jnp.float32)
    packed_params, raw_params = init_params(kp, size_list)

    out = my_model_forward(x, packed_params, size_list)
    jax.block_until_ready(out)

    assert out.shape == (batch, size_list[-1])
    assert bool(jnp.all(jnp.isfinite(out)))

    ref = _ref_forward(x, raw_params)
    # Conservative tolerance; f32 matmuls should match far tighter in practice.
    assert bool(jnp.allclose(out, ref, atol=1e-1, rtol=1e-1)), (
        f"max abs err {float(jnp.max(jnp.abs(out - ref)))}")

    print("KERNEL_OK")
</pallas_src>

<mosaic_0001>
module attributes {stable_mosaic.version = 11 : i64} {
  func.func @_fused_mlp_kernel(%arg0: memref<8x32xf32, #tpu.memory_space<vmem>>, %arg1: memref<32x128xf32, #tpu.memory_space<vmem>>, %arg2: memref<128x128xf32, #tpu.memory_space<vmem>>, %arg3: memref<128x16xf32, #tpu.memory_space<vmem>>, %arg4: memref<7x128xf32, #tpu.memory_space<vmem>>, %arg5: memref<8x16xf32, #tpu.memory_space<vmem>>) attributes {dimension_semantics = [], scalar_prefetch = 0 : i64, scratch_operands = 0 : i64, tpu.core_type = #tpu.core_type<tc>} {
    %c0 = arith.constant 0 : index
    %c0_0 = arith.constant 0 : index
    %0 = vector.load %arg4[%c0, %c0_0] : memref<7x128xf32, #tpu.memory_space<vmem>>, vector<7x128xf32>
    %c0_1 = arith.constant 0 : index
    %c0_2 = arith.constant 0 : index
    %1 = vector.load %arg0[%c0_1, %c0_2] : memref<8x32xf32, #tpu.memory_space<vmem>>, vector<8x32xf32>
    %2 = vector.extract_strided_slice %0 {offsets = [0, 0], sizes = [1, 128], strides = [1, 1]} : vector<7x128xf32> to vector<1x128xf32>
    %3 = vector.extract_strided_slice %0 {offsets = [1, 0], sizes = [1, 128], strides = [1, 1]} : vector<7x128xf32> to vector<1x128xf32>
    %4 = vector.extract_strided_slice %0 {offsets = [2, 0], sizes = [1, 128], strides = [1, 1]} : vector<7x128xf32> to vector<1x128xf32>
    %c0_3 = arith.constant 0 : index
    %c0_4 = arith.constant 0 : index
    %5 = vector.load %arg1[%c0_3, %c0_4] : memref<32x128xf32, #tpu.memory_space<vmem>>, vector<32x128xf32>
    %cst = arith.constant dense<0.000000e+00> : vector<8x128xf32>
    %6 = tpu.matmul %1, %5, %cst {dimension_numbers = #tpu.dot_dimension_numbers<[1], [0], [0], [1], [0, 0, 1, 1], [], []>} : vector<8x32xf32>, vector<32x128xf32>, vector<8x128xf32> -> vector<8x128xf32>
    %7 = vector.broadcast %2 : vector<1x128xf32> to vector<8x128xf32>
    %8 = arith.addf %6, %7 : vector<8x128xf32>
    %cst_5 = arith.constant dense<0.000000e+00> : vector<128xf32>
    %9 = vector.multi_reduction <add>, %8, %cst_5 [0] : vector<8x128xf32> to vector<128xf32>
    %10 = vector.shape_cast %9 : vector<128xf32> to vector<1x128xf32>
    %cst_6 = arith.constant 1.250000e-01 : f32
    %11 = vector.broadcast %cst_6 : f32 to vector<1x128xf32>
    %12 = arith.mulf %10, %11 : vector<1x128xf32>
    %13 = vector.broadcast %12 : vector<1x128xf32> to vector<8x128xf32>
    %14 = arith.subf %8, %13 : vector<8x128xf32>
    %15 = arith.mulf %14, %14 : vector<8x128xf32>
    %cst_7 = arith.constant dense<0.000000e+00> : vector<128xf32>
    %16 = vector.multi_reduction <add>, %15, %cst_7 [0] : vector<8x128xf32> to vector<128xf32>
    %17 = vector.shape_cast %16 : vector<128xf32> to vector<1x128xf32>
    %cst_8 = arith.constant 1.250000e-01 : f32
    %18 = vector.broadcast %cst_8 : f32 to vector<1x128xf32>
    %19 = arith.mulf %17, %18 : vector<1x128xf32>
    %cst_9 = arith.constant 9.99999974E-6 : f32
    %20 = vector.broadcast %cst_9 : f32 to vector<1x128xf32>
    %21 = arith.addf %19, %20 : vector<1x128xf32>
    %22 = math.rsqrt %21 : vector<1x128xf32>
    %23 = arith.mulf %22, %3 : vector<1x128xf32>
    %24 = arith.mulf %12, %23 : vector<1x128xf32>
    %25 = arith.subf %4, %24 : vector<1x128xf32>
    %26 = vector.broadcast %23 : vector<1x128xf32> to vector<8x128xf32>
    %27 = arith.mulf %8, %26 : vector<8x128xf32>
    %28 = vector.broadcast %25 : vector<1x128xf32> to vector<8x128xf32>
    %29 = arith.addf %27, %28 : vector<8x128xf32>
    %cst_10 = arith.constant 0.000000e+00 : f32
    %30 = vector.broadcast %cst_10 : f32 to vector<8x128xf32>
    %31 = arith.maximumf %29, %30 : vector<8x128xf32>
    %32 = vector.extract_strided_slice %0 {offsets = [3, 0], sizes = [1, 128], strides = [1, 1]} : vector<7x128xf32> to vector<1x128xf32>
    %33 = vector.extract_strided_slice %0 {offsets = [4, 0], sizes = [1, 128], strides = [1, 1]} : vector<7x128xf32> to vector<1x128xf32>
    %34 = vector.extract_strided_slice %0 {offsets = [5, 0], sizes = [1, 128], strides = [1, 1]} : vector<7x128xf32> to vector<1x128xf32>
    %c0_11 = arith.constant 0 : index
    %c0_12 = arith.constant 0 : index
    %35 = vector.load %arg2[%c0_11, %c0_12] : memref<128x128xf32, #tpu.memory_space<vmem>>, vector<128x128xf32>
    %cst_13 = arith.constant dense<0.000000e+00> : vector<8x128xf32>
    %36 = tpu.matmul %31, %35, %cst_13 {dimension_numbers = #tpu.dot_dimension_numbers<[1], [0], [0], [1], [0, 0, 1, 1], [], []>} : vector<8x128xf32>, vector<128x128xf32>, vector<8x128xf32> -> vector<8x128xf32>
    %37 = vector.broadcast %32 : vector<1x128xf32> to vector<8x128xf32>
    %38 = arith.addf %36, %37 : vector<8x128xf32>
    %cst_14 = arith.constant dense<0.000000e+00> : vector<128xf32>
    %39 = vector.multi_reduction <add>, %38, %cst_14 [0] : vector<8x128xf32> to vector<128xf32>
    %40 = vector.shape_cast %39 : vector<128xf32> to vector<1x128xf32>
    %cst_15 = arith.constant 1.250000e-01 : f32
    %41 = vector.broadcast %cst_15 : f32 to vector<1x128xf32>
    %42 = arith.mulf %40, %41 : vector<1x128xf32>
    %43 = vector.broadcast %42 : vector<1x128xf32> to vector<8x128xf32>
    %44 = arith.subf %38, %43 : vector<8x128xf32>
    %45 = arith.mulf %44, %44 : vector<8x128xf32>
    %cst_16 = arith.constant dense<0.000000e+00> : vector<128xf32>
    %46 = vector.multi_reduction <add>, %45, %cst_16 [0] : vector<8x128xf32> to vector<128xf32>
    %47 = vector.shape_cast %46 : vector<128xf32> to vector<1x128xf32>
    %cst_17 = arith.constant 1.250000e-01 : f32
    %48 = vector.broadcast %cst_17 : f32 to vector<1x128xf32>
    %49 = arith.mulf %47, %48 : vector<1x128xf32>
    %cst_18 = arith.constant 9.99999974E-6 : f32
    %50 = vector.broadcast %cst_18 : f32 to vector<1x128xf32>
    %51 = arith.addf %49, %50 : vector<1x128xf32>
    %52 = math.rsqrt %51 : vector<1x128xf32>
    %53 = arith.mulf %52, %33 : vector<1x128xf32>
    %54 = arith.mulf %42, %53 : vector<1x128xf32>
    %55 = arith.subf %34, %54 : vector<1x128xf32>
    %56 = vector.broadcast %53 : vector<1x128xf32> to vector<8x128xf32>
    %57 = arith.mulf %38, %56 : vector<8x128xf32>
    %58 = vector.broadcast %55 : vector<1x128xf32> to vector<8x128xf32>
    %59 = arith.addf %57, %58 : vector<8x128xf32>
    %cst_19 = arith.constant 0.000000e+00 : f32
    %60 = vector.broadcast %cst_19 : f32 to vector<8x128xf32>
    %61 = arith.maximumf %59, %60 : vector<8x128xf32>
    %62 = vector.extract_strided_slice %0 {offsets = [6, 0], sizes = [1, 16], strides = [1, 1]} : vector<7x128xf32> to vector<1x16xf32>
    %c0_20 = arith.constant 0 : index
    %c0_21 = arith.constant 0 : index
    %63 = vector.load %arg3[%c0_20, %c0_21] : memref<128x16xf32, #tpu.memory_space<vmem>>, vector<128x16xf32>
    %cst_22 = arith.constant dense<0.000000e+00> : vector<8x16xf32>
    %64 = tpu.matmul %61, %63, %cst_22 {dimension_numbers = #tpu.dot_dimension_numbers<[1], [0], [0], [1], [0, 0, 1, 1], [], []>} : vector<8x128xf32>, vector<128x16xf32>, vector<8x16xf32> -> vector<8x16xf32>
    %65 = vector.broadcast %62 : vector<1x16xf32> to vector<8x16xf32>
    %66 = arith.addf %64, %65 : vector<8x16xf32>
    %c0_23 = arith.constant 0 : index
    %c0_24 = arith.constant 0 : index
    %67 = vector.load %arg5[%c0_23, %c0_24] : memref<8x16xf32, #tpu.memory_space<vmem>>, vector<8x16xf32>
    tpu.vector_store %arg5[%c0_23, %c0_24], %66 {strides = array<i32>} : memref<8x16xf32, #tpu.memory_space<vmem>>, vector<8x16xf32>,
    return
  }
}

</mosaic_0001>

<bundles_post_ra>
// kernel: my_model_forward.1
= control target key start
LH: loop header
LB: loop body
LE: loop exit
PB: predicated region body
PF: predicated region fallthrough
CT: control target
= control target key end

     0   :  { %10 = vsyncpa [#allocation3], 0  ;;  %s765_s0 = inlined_call_operand.vmem [shape: f32[8,32], index: 0, kind: input, shape index: {}]   ;;  %s766_s1 = inlined_call_operand.hbm [shape: f32[32,128], index: 1, kind: input, shape index: {}]   ;;  %s767_s2 = inlined_call_operand.vmem [shape: f32[128,128], index: 2, kind: input, shape index: {}]   ;;  %s768_s3 = inlined_call_operand.vmem [shape: f32[128,16], index: 3, kind: input, shape index: {}]   ;;  %s769_s4 = inlined_call_operand.vmem [shape: f32[7,128], index: 4, kind: input, shape index: {}]   ;;  %s770_s5 = inlined_call_operand.hbm [shape: f32[8,16], index: 5, kind: output, shape index: {}]  }
   0x1   :  { %11 = vsyncpa [#allocation4], 0  ;;  %s561_s18 = smov [#allocation2]  }
   0x2   :  { %s19_s19 = sshll.u32 %s561_s18, 4  ;;  %s20_s19 = int_to_ptr.vmem [resolvable:$true] %s19_s19 }
   0x3   :  { %s525_s20 = scalar_lea.vmem %s20_s19, 512  ;;  %p530_p1 = scmp.lt.s32.totalorder %s20_s19, %s20_s19 }
   0x4   :  { %p526_p0 = scmp.ne.s32.totalorder %s20_s19, %s525_s20  ;;  %p531_p2 = scmp.lt.s32.totalorder %s525_s20, %s525_s20 }
   0x6   :  { %p532_p3 = por %p531_p2, %p530_p1 }
   0x8   :  { %p533_p4 = pnand %p532_p3, %p526_p0 }
   0xa   :  { %536 = shalt.err (!%p533_p4)
}
   0xb   :  { %s562_s21 = smov 128   ;;  %s563_s22 = smov 8  }
   0xc   :  { %25 = dma.hbm_to_vmem [thread:$0]  %s766_s1, 512, %s20_s19, [#allocation3], %s562_s21, %s562_s21, %s563_s22  }
   0xd   :  { %557 = dma.done.wait [#allocation3], 512  }
   0xe   :  { %558 = vsyncadd [#allocation3], 4294966784  ;;  %v564_v0 = vmov 0.0   ;;  %vm565_vm0 = vmmov 0   ;;  %v40_v1 = vld [vmem:[#allocation2 + $0x18] sm:$0xff]  ;;  %v39_v2 = vld [vmem:[#allocation2 + $0x10] sm:$0xff]  ;;  %v41_v22 = vlaneseq }
   0xf   :  { %426 = vmatprep.subr.mxu0 %v564_v0  ;;  %434 = vmatprep.mubr.msk.f32.mxu0 %vm565_vm0, %v564_v0  ;;  %v38_v3 = vld [vmem:[#allocation2 + $0x8] sm:$0xff]  ;;  %v37_v4 = vld [vmem:[#allocation2] sm:$0xff]  ;;  %vm45_vm1 = vcmask 261120   ;;  %v169_v6 = vld [vmem:[%s767_s2 + $0x78] sm:$0xff]  ;;  %vm369_vm2 = vcmask 130048  }
  0x10   :  { %437 = vmatprep.subr.mxu1 %v564_v0  ;;  %469 = vmatprep.mubr.msk.f32.mxu1 %vm565_vm0, %v564_v0  ;;  %v36_v5 = vld [vmem:[%s765_s0] sm:$0xff]  ;;  %v168_v7 = vld [vmem:[%s767_s2 + $0x70] sm:$0xff]  ;;  %v167_v8 = vld [vmem:[%s767_s2 + $0x68] sm:$0xff]  ;;  %v678_v23 = vshrl.u32 %v41_v22, 7 }
  0x11   :  { %427 = vmatpush3.msra.mxu0 %v40_v1  ;;  %438 = vmatpush3.msra.mxu1 %v169_v6  ;;  %v166_v9 = vld [vmem:[%s767_s2 + $0x60] sm:$0xff]  ;;  %v165_v10 = vld [vmem:[%s767_s2 + $0x58] sm:$0xff]  ;;  %v164_v11 = vld [vmem:[%s767_s2 + $0x50] sm:$0xff] }
  0x12   :  { %428 = vmatprep.subr.mxu0 %v564_v0  ;;  %439 = vmatprep.subr.mxu1 %v564_v0  ;;  %v163_v12 = vld [vmem:[%s767_s2 + $0x48] sm:$0xff]  ;;  %v162_v13 = vld [vmem:[%s767_s2 + $0x40] sm:$0xff]  ;;  %v161_v14 = vld [vmem:[%s767_s2 + $0x38] sm:$0xff]  ;;  %v43_v24 = vsub.s32 0, %v678_v23  ;;  %v145_v49 = vsub.s32 1, %v678_v23  ;;  %v150_v53 = vsub.s32 2, %v678_v23 }
  0x13   :  { %429 = vmatpush3.msra.mxu0 %v39_v2  ;;  %440 = vmatpush3.msra.mxu1 %v168_v7  ;;  %v160_v15 = vld [vmem:[%s767_s2 + $0x30] sm:$0xff]  ;;  %v159_v16 = vld [vmem:[%s767_s2 + $0x28] sm:$0xff]  ;;  %v158_v17 = vld [vmem:[%s767_s2 + $0x20] sm:$0xff] }
  0x14   :  { %430 = vmatprep.subr.mxu0 %v564_v0  ;;  %441 = vmatprep.subr.mxu1 %v564_v0  ;;  %v157_v18 = vld [vmem:[%s767_s2 + $0x18] sm:$0xff]  ;;  %v156_v19 = vld [vmem:[%s767_s2 + $0x10] sm:$0xff]  ;;  %v155_v20 = vld [vmem:[%s767_s2 + $0x8] sm:$0xff] }
  0x15   :  { %431 = vmatpush3.msra.mxu0 %v38_v3  ;;  %442 = vmatpush3.msra.mxu1 %v167_v8  ;;  %v154_v21 = vld [vmem:[%s767_s2] sm:$0xff]  ;;  %v294_v59 = vld [vmem:[%s768_s3 + $0x78] sm:$0xff]  ;;  %v293_v60 = vld [vmem:[%s768_s3 + $0x70] sm:$0xff] }
  0x16   :  { %432 = vmatprep.subr.mxu0 %v564_v0  ;;  %443 = vmatprep.subr.mxu1 %v564_v0  ;;  %v684_v25 = vld [vmem:[%s769_s4] sm:$0x7f]  ;;  %v292_v61 = vld [vmem:[%s768_s3 + $0x68] sm:$0xff]  ;;  %v290_v63 = vld [vmem:[%s768_s3 + $0x58] sm:$0xff] }
  0x17   :  { %433 = vmatpush3.msra.mxu0 %v37_v4  ;;  %444 = vmatpush3.msra.mxu1 %v166_v9  ;;  %v44_v26 = vrot.slane %v684_v25, %v43_v24  ;;  %v291_v62 = vld [vmem:[%s768_s3 + $0x60] sm:$0xff]  ;;  %v289_v1 = vld [vmem:[%s768_s3 + $0x50] sm:$0xff]  ;;  %v288_v2 = vld [vmem:[%s768_s3 + $0x48] sm:$0xff] }
  0x18   :  { %435 = vmatmul.mubr.msk.f32.vlgmr.msra.gmra.mxu0 %vm45_vm1, %v36_v5  ;;  %472 = vmatprep.subr.mxu0 %v564_v0  ;;  %v287_v3 = vld [vmem:[%s768_s3 + $0x40] sm:$0xff]  ;;  %v286_v4 = vld [vmem:[%s768_s3 + $0x38] sm:$0xff]  ;;  %v285_v5 = vld [vmem:[%s768_s3 + $0x30] sm:$0xff] }
  0x19   :  { %504 = vmatprep.mubr.msk.f32.mxu0 %vm565_vm0, %v564_v0  ;;  %445 = vmatprep.subr.mxu1 %v564_v0  ;;  %v284_v6 = vld [vmem:[%s768_s3 + $0x28] sm:$0xff]  ;;  %v283_v7 = vld [vmem:[%s768_s3 + $0x20] sm:$0xff]  ;;  %v282_v8 = vld [vmem:[%s768_s3 + $0x18] sm:$0xff] }
  0x1a   :  { %446 = vmatpush3.msra.mxu1 %v165_v10  ;;  %473 = vmatpush3.msra.mxu0 %v294_v59  ;;  %v281_v9 = vld [vmem:[%s768_s3 + $0x10] sm:$0xff]  ;;  %v280_v10 = vld [vmem:[%s768_s3 + $0x8] sm:$0xff] }
  0x1b   :  { %447 = vmatprep.subr.mxu1 %v564_v0  ;;  %474 = vmatprep.subr.mxu0 %v564_v0 }
  0x1c   :  { %448 = vmatpush3.msra.mxu1 %v164_v11  ;;  %475 = vmatpush3.msra.mxu0 %v293_v60  ;;  %v279_v11 = vld [vmem:[%s768_s3] sm:$0xff]  ;;  %s566_s3 = smov [#allocation5]  }
  0x1d   :  { %449 = vmatprep.subr.mxu1 %v564_v0  ;;  %476 = vmatprep.subr.mxu0 %v564_v0  ;;  %s377_s8 = sshll.u32 %s566_s3, 4  ;;  %s378_s8 = int_to_ptr.vmem [resolvable:$true] %s377_s8 }
  0x1e   :  { %450 = vmatpush3.msra.mxu1 %v163_v12  ;;  %477 = vmatpush3.msra.mxu0 %v292_v61  ;;  %v172_v12 = vsub.s32 3, %v678_v23  ;;  %s537_s9 = scalar_lea.vmem %s378_s8, 128  ;;  %p542_p6 = scmp.lt.s32.totalorder %s378_s8, %s378_s8 }
  0x1f   :  { %451 = vmatprep.subr.mxu1 %v564_v0  ;;  %478 = vmatprep.subr.mxu0 %v564_v0  ;;  %p538_p5 = scmp.ne.s32.totalorder %s378_s8, %s537_s9  ;;  %p543_p7 = scmp.lt.s32.totalorder %s537_s9, %s537_s9 }
  0x20   :  { %452 = vmatpush3.msra.mxu1 %v162_v13  ;;  %479 = vmatpush3.msra.mxu0 %v291_v62  ;;  %v173_v13 = vrot.slane %v684_v25, %v172_v12 }
  0x21   :  { %453 = vmatprep.subr.mxu1 %v564_v0  ;;  %480 = vmatprep.subr.mxu0 %v564_v0  ;;  %p544_p8 = por %p543_p7, %p542_p6 }
  0x22   :  { %454 = vmatpush3.msra.mxu1 %v161_v14  ;;  %481 = vmatpush3.msra.mxu0 %v290_v63 }
  0x23   :  { %455 = vmatprep.subr.mxu1 %v564_v0  ;;  %482 = vmatprep.subr.mxu0 %v564_v0  ;;  %p545_p9 = pnand %p544_p8, %p538_p5 }
  0x24   :  { %456 = vmatpush3.msra.mxu1 %v160_v15  ;;  %483 = vmatpush3.msra.mxu0 %v289_v1 }
  0x25   :  { %457 = vmatprep.subr.mxu1 %v564_v0  ;;  %484 = vmatprep.subr.mxu0 %v564_v0 }
  0x26   :  { %458 = vmatpush3.msra.mxu1 %v159_v16  ;;  %485 = vmatpush3.msra.mxu0 %v288_v2 }
  0x27   :  { %459 = vmatprep.subr.mxu1 %v564_v0  ;;  %486 = vmatprep.subr.mxu0 %v564_v0 }
  0x28   :  { %460 = vmatpush3.msra.mxu1 %v158_v17  ;;  %487 = vmatpush3.msra.mxu0 %v287_v3 }
  0x29   :  { %461 = vmatprep.subr.mxu1 %v564_v0  ;;  %488 = vmatprep.subr.mxu0 %v564_v0 }
  0x2a   :  { %462 = vmatpush3.msra.mxu1 %v157_v18  ;;  %489 = vmatpush3.msra.mxu0 %v286_v4 }
  0x2b   :  { %463 = vmatprep.subr.mxu1 %v564_v0  ;;  %490 = vmatprep.subr.mxu0 %v564_v0 }
  0x2c   :  { %464 = vmatpush3.msra.mxu1 %v156_v19  ;;  %491 = vmatpush3.msra.mxu0 %v285_v5 }
  0x2d   :  { %465 = vmatprep.subr.mxu1 %v564_v0  ;;  %492 = vmatprep.subr.mxu0 %v564_v0 }
  0x2e   :  { %466 = vmatpush3.msra.mxu1 %v155_v20  ;;  %493 = vmatpush3.msra.mxu0 %v284_v6 }
  0x2f   :  { %467 = vmatprep.subr.mxu1 %v564_v0  ;;  %494 = vmatprep.subr.mxu0 %v564_v0 }
  0x30   :  { %468 = vmatpush3.msra.mxu1 %v154_v21  ;;  %495 = vmatpush3.msra.mxu0 %v283_v7 }
  0x31   :  { %496 = vmatprep.subr.mxu0 %v564_v0 }
  0x32   :  { %497 = vmatpush3.msra.mxu0 %v282_v8 }
  0x33   :  { %498 = vmatprep.subr.mxu0 %v564_v0 }
  0x34   :  { %499 = vmatpush3.msra.mxu0 %v281_v9 }
  0x35   :  { %500 = vmatprep.subr.mxu0 %v564_v0 }
  0x36   :  { %501 = vmatpush3.msra.mxu0 %v280_v10 }
  0x37   :  { %502 = vmatprep.subr.mxu0 %v564_v0 }
  0x38   :  { %503 = vmatpush3.msra.mxu0 %v279_v11 }
  0xd8   :  { %v115_v27 = vpop.f32.mrf.mxu0 }
  0xd9   :  { %v116_v28 = vadd.f32 %v115_v27, %v44_v26 }
  0xda   :  { %v436_v29 = vpop.f32.mrf.mxu0 }
  0xdb   :  { %v119_v30 = vrot.slane %v116_v28, 4 }
  0xdd   :  { %v120_v31 = vadd.f32 %v119_v30, %v116_v28 }
  0xdf   :  { %v121_v32 = vrot.slane %v120_v31, 2 }
  0xe1   :  { %v122_v33 = vadd.f32 %v121_v32, %v120_v31 }
  0xe3   :  { %v123_v34 = vrot.slane %v122_v33, 1 }
  0xe5   :  { %v124_v35 = vadd.f32 %v123_v34, %v122_v33 }
  0xe7   :  { %v125_v36 = vmul.f32 0.125, %v124_v35 }
  0xe9   :  { %v126_v37 = vsub.f32 %v116_v28, %v125_v36 }
  0xeb   :  { %v127_v38 = vmul.f32 %v126_v37, %v126_v37  ;;  %v270_v37 = vsub.s32 4, %v678_v23 }
  0xed   :  { %v128_v39 = vrot.slane %v127_v38, 4 }
  0xef   :  { %v129_v40 = vadd.f32 %v128_v39, %v127_v38 }
  0xf1   :  { %v130_v41 = vrot.slane %v129_v40, 2 }
  0xf3   :  { %v131_v42 = vadd.f32 %v130_v41, %v129_v40  ;;  %v275_v41 = vsub.s32 5, %v678_v23 }
  0xf5   :  { %v132_v43 = vrot.slane %v131_v42, 1 }
  0xf7   :  { %v133_v44 = vadd.f32 %v132_v43, %v131_v42 }
  0xf9   :  { %v134_v45 = vmul.f32 0.125, %v133_v44 }
  0xfb   :  { %v135_v46 = vadd.f32 1e-05, %v134_v45 }
  0xfd   :  { %513 = vrsqrt.f32 %v135_v46 }
 0x10a   :  { %v514_v47 = vpop.eup %513 }
 0x10b   :  { %v137_v48 = vmul.f32 %v514_v47, %v684_v25  ;;  %v297_v47 = vsub.s32 6, %v678_v23 }
 0x10d   :  { %v138_v50 = vmul.f32 %v137_v48, %v125_v36  ;;  %v146_v52 = vrot.slane %v137_v48, %v145_v49  ;;  %v298_v48 = vrot.slane %v684_v25, %v297_v47 }
 0x10f   :  { %v140_v51 = vrot.slane %v138_v50, 7  ;;  %v147_v55 = vmul.f32 %v146_v52, %v116_v28 }
 0x111   :  { %v142_v54 = vsub.f32 %v684_v25, %v140_v51 }
 0x113   :  { %v151_v56 = vrot.slane %v142_v54, %v150_v53 }
 0x115   :  { %v152_v57 = vadd.f32 %v151_v56, %v147_v55 }
 0x117   :  { %v153_v58 = vmax.f32 %v152_v57, 0.0 }
 0x119   :  { %470 = vmatmul.mubr.f32.vlgmr.msra.gmra.mxu1 %v153_v58 }
 0x1d9   :  { %v240_v14 = vpop.f32.mrf.mxu1 }
 0x1da   :  { %v241_v15 = vadd.f32 %v240_v14, %v173_v13 }
 0x1db   :  { %v471_v16 = vpop.f32.mrf.mxu1 }
 0x1dc   :  { %v244_v17 = vrot.slane %v241_v15, 4 }
 0x1de   :  { %v245_v18 = vadd.f32 %v244_v17, %v241_v15 }
 0x1e0   :  { %v246_v19 = vrot.slane %v245_v18, 2 }
 0x1e2   :  { %v247_v20 = vadd.f32 %v246_v19, %v245_v18 }
 0x1e4   :  { %v248_v21 = vrot.slane %v247_v20, 1 }
 0x1e6   :  { %v249_v22 = vadd.f32 %v248_v21, %v247_v20 }
 0x1e8   :  { %v250_v24 = vmul.f32 0.125, %v249_v22 }
 0x1ea   :  { %v251_v26 = vsub.f32 %v241_v15, %v250_v24 }
 0x1ec   :  { %v252_v27 = vmul.f32 %v251_v26, %v251_v26 }
 0x1ee   :  { %v253_v28 = vrot.slane %v252_v27, 4 }
 0x1f0   :  { %v254_v29 = vadd.f32 %v253_v28, %v252_v27 }
 0x1f2   :  { %v255_v0 = vrot.slane %v254_v29, 2 }
 0x1f4   :  { %v256_v30 = vadd.f32 %v255_v0, %v254_v29 }
 0x1f6   :  { %v257_v31 = vrot.slane %v256_v30, 1 }
 0x1f8   :  { %v258_v32 = vadd.f32 %v257_v31, %v256_v30 }
 0x1fa   :  { %v259_v33 = vmul.f32 0.125, %v258_v32 }
 0x1fc   :  { %v260_v34 = vadd.f32 1e-05, %v259_v33 }
 0x1fe   :  { %515 = vrsqrt.f32 %v260_v34 }
 0x20b   :  { %v516_v35 = vpop.eup %515 }
 0x20c   :  { %v262_v36 = vmul.f32 %v516_v35, %v684_v25 }
 0x20e   :  { %v263_v38 = vmul.f32 %v262_v36, %v250_v24  ;;  %v271_v40 = vrot.slane %v262_v36, %v270_v37 }
 0x210   :  { %v265_v39 = vrot.slane %v263_v38, 7  ;;  %v272_v43 = vmul.f32 %v271_v40, %v241_v15 }
 0x212   :  { %v267_v42 = vsub.f32 %v684_v25, %v265_v39 }
 0x214   :  { %v276_v44 = vrot.slane %v267_v42, %v275_v41 }
 0x216   :  { %v277_v45 = vadd.f32 %v276_v44, %v272_v43 }
 0x218   :  { %v278_v46 = vmax.f32 %v277_v45, 0.0 }
 0x21a   :  { %505 = vmatmul.mubr.f32.vlgmr.msra.gmra.mxu0 %v278_v46 }
 0x2da   :  { %v365_v49 = vpop.f32.mrf.mxu0 }
 0x2db   :  { %v366_v50 = vadd.f32 %v365_v49, %v298_v48 }
 0x2dc   :  { %v506_v51 = vpop.f32.mrf.mxu0 }
 0x2dd   :  { %370 = vst.msk [vmem:[#allocation5] sm:$0xff] %vm369_vm2, %v366_v50 }
 0x2de   :  { %548 = shalt.err (!%p545_p9)
}
 0x2df   :  { %380 = dma.vmem_to_hbm [thread:$0]  %s378_s8, 128, %s770_s5, [#allocation4]  }
 0x2e0   :  { %559 = dma.done.wait [#allocation4], 128  }
 0x2e1   :  { %560 = vsyncadd [#allocation4], 4294967168 }
 0x2e2   :  { %384 = vsyncpa [#allocation3], 1 }
 0x2e3   :  { %385 = vsyncpa [#allocation4], 1 }

</bundles_post_ra>
